<compile_context>
chip_gen: v6e
topology: v6e:2x2x1
jax: 0.10.0
libtpu: 0.0.40
codegen_flags: <defaults>
</compile_context>

<pallas_src>
import math

import jax
import jax.numpy as jnp
from jax import lax
from jax.experimental import pallas as pl
from jax.experimental.pallas import tpu as pltpu

_INV_SQRT2 = math.sqrt(0.5)  # Python float -> trace-time literal (no captured jnp constant)


def _layernorm(x, g, b, eps=1e-5):
    mu = jnp.mean(x, axis=-1, keepdims=True)
    var = jnp.mean((x - mu) ** 2, axis=-1, keepdims=True)
    return (x - mu) * lax.rsqrt(var + eps) * g + b


def make_block_kernel(S, D, H):
    assert D % H == 0, "dim must be divisible by num_heads"
    hd = D // H
    scale = 1.0 / math.sqrt(hd)  # Python float

    def kernel(x_ref, ln1g_ref, ln1b_ref, wqkv_ref, bqkv_ref, wo_ref, bo_ref,
               ln2g_ref, ln2b_ref, w1_ref, b1_ref, w2_ref, b2_ref,
               o_ref, attn_scr):
        # One grid step == one batch element; x_ref is that element's (S, D) slice.
        x = x_ref[...].astype(jnp.float32)

        # ---------- LayerNorm 1 (f32 elementwise) ----------
        xn = _layernorm(x, ln1g_ref[...], ln1b_ref[...])

        # ---------- fused QKV projection (bf16 in, f32 accumulate) ----------
        qkv = jnp.dot(xn.astype(jnp.bfloat16), wqkv_ref[...],
                      preferred_element_type=jnp.float32) + bqkv_ref[...]     # (S, 3D) f32

        # Split and cast to bf16 ONCE; fold 1/sqrt(hd) into q before the cast.
        q_all = (qkv[:, :D] * scale).astype(jnp.bfloat16)                      # (S, D) bf16
        k_all = qkv[:, D:2 * D].astype(jnp.bfloat16)                           # (S, D) bf16
        v_all = qkv[:, 2 * D:].astype(jnp.bfloat16)                            # (S, D) bf16

        # Causal mask: strictly-upper = -inf (== torch.triu(full(-inf), diagonal=1)).
        # Safe here because every row has a finite diagonal entry.
        row = lax.broadcasted_iota(jnp.int32, (S, S), 0)
        col = lax.broadcasted_iota(jnp.int32, (S, S), 1)
        mask = jnp.where(col > row, -jnp.inf, 0.0).astype(jnp.float32)         # (S, S)

        # ---------- multi-head attention (plain 2-D dots; batch handled by the grid) ----------
        # Static unroll is fine for the demo H; use a heads grid axis / fori_loop at large H.
        for h in range(H):
            q_h = q_all[:, h * hd:(h + 1) * hd]                                # (S, hd) bf16
            k_h = k_all[:, h * hd:(h + 1) * hd]
            v_h = v_all[:, h * hd:(h + 1) * hd]

            # scores = q @ k^T via dot_general (contract last dims; no explicit transpose)
            s = lax.dot_general(q_h, k_h, (((1,), (1,)), ((), ())),
                                preferred_element_type=jnp.float32)            # (S, S) f32
            s = s + mask
            m = jnp.max(s, axis=-1, keepdims=True)
            e = jnp.exp(s - m)                                                 # unnormalized
            denom = jnp.sum(e, axis=-1, keepdims=True)                         # (S, 1) f32

            # Deferred normalization: PV on unnormalized e, divide the (S, hd) result.
            o_h = jnp.dot(e.astype(jnp.bfloat16), v_h,
                          preferred_element_type=jnp.float32)                  # (S, hd) f32
            o_h = o_h / denom
            attn_scr[:, h * hd:(h + 1) * hd] = o_h.astype(jnp.bfloat16)        # bf16 scratch

        # ---------- output projection + residual (off ln_1(x)) ----------
        a = jnp.dot(attn_scr[...], wo_ref[...],
                    preferred_element_type=jnp.float32) + bo_ref[...]
        x1 = xn + a

        # ---------- LayerNorm 2 + MLP (Linear -> exact erf GELU -> Linear) ----------
        x2 = _layernorm(x1, ln2g_ref[...], ln2b_ref[...])
        hmid = jnp.dot(x2.astype(jnp.bfloat16), w1_ref[...],
                       preferred_element_type=jnp.float32) + b1_ref[...]
        hmid = 0.5 * hmid * (1.0 + lax.erf(hmid * _INV_SQRT2))
        mlp = jnp.dot(hmid.astype(jnp.bfloat16), w2_ref[...],
                      preferred_element_type=jnp.float32) + b2_ref[...]

        o_ref[...] = (x1 + mlp).astype(o_ref.dtype)

    return kernel


def prepare_block_params(params_f32):
    """Cast matmul weights to bf16 ONCE (outside the per-call path). Biases / LN stay f32."""
    p = dict(params_f32)
    for name in ('wqkv', 'wo', 'w1', 'w2'):
        p[name] = params_f32[name].astype(jnp.bfloat16)
    return p


def transformer_block(x_sbd, params, num_heads):
    """x_sbd: (S, B, D) float32, seq-first like PyTorch nn.MultiheadAttention."""
    S, B, D = x_sbd.shape
    kernel = make_block_kernel(S, D, num_heads)

    # batch-first layout so each grid step's block has full (S, D) as its last two dims
    x_bsd = jnp.transpose(x_sbd, (1, 0, 2))                                     # (B, S, D)

    def resident(shape):
        # full-array block, constant index -> DMA'd once, stays VMEM-resident across the grid
        nd = len(shape)
        return pl.BlockSpec(shape, lambda b, _nd=nd: (0,) * _nd)

    batch_spec = pl.BlockSpec((None, S, D), lambda b: (b, 0, 0))                # kernel sees (S, D)

    in_specs = [
        batch_spec,                                        # x, tiled per batch element
        resident((1, D)), resident((1, D)),                # ln1 gamma/beta
        resident((D, 3 * D)), resident((1, 3 * D)),        # qkv weight (bf16) / bias
        resident((D, D)), resident((1, D)),                # out_proj weight (bf16) / bias
        resident((1, D)), resident((1, D)),                # ln2 gamma/beta
        resident((D, 4 * D)), resident((1, 4 * D)),        # mlp fc1 weight (bf16) / bias
        resident((4 * D, D)), resident((1, D)),            # mlp fc2 weight (bf16) / bias
    ]

    out = pl.pallas_call(
        kernel,
        out_shape=jax.ShapeDtypeStruct((B, S, D), x_sbd.dtype),
        grid=(B,),
        in_specs=in_specs,
        out_specs=batch_spec,
        scratch_shapes=[pltpu.VMEM((S, D), jnp.bfloat16)],                      # attn head-concat scratch
        compiler_params=pltpu.CompilerParams(
            dimension_semantics=("parallel",)),                                 # v7x megacore sharding
    )(x_bsd,
      params['ln1_g'], params['ln1_b'],
      params['wqkv'], params['bqkv'],
      params['wo'], params['bo'],
      params['ln2_g'], params['ln2_b'],
      params['w1'], params['b1'],
      params['w2'], params['b2'])

    return jnp.transpose(out, (1, 0, 2))                                        # back to (S, B, D)


def reference_block(x_sbd, params, num_heads):
    """Pure-JAX f32 reference of the same math (for correctness check)."""
    S, B, D = x_sbd.shape
    H = num_heads
    hd = D // H
    x = jnp.transpose(x_sbd, (1, 0, 2)).astype(jnp.float32)                     # (B, S, D)

    xn = _layernorm(x, params['ln1_g'], params['ln1_b'])
    qkv = xn @ params['wqkv'] + params['bqkv']
    q, k, v = qkv[..., :D], qkv[..., D:2 * D], qkv[..., 2 * D:]
    qh = q.reshape(B, S, H, hd)
    kh = k.reshape(B, S, H, hd)
    vh = v.reshape(B, S, H, hd)
    mask = jnp.where(jnp.arange(S)[None, :] > jnp.arange(S)[:, None], -jnp.inf, 0.0)
    s = jnp.einsum('bqhd,bkhd->bhqk', qh / math.sqrt(hd), kh) + mask
    p = jax.nn.softmax(s, axis=-1)
    a = jnp.einsum('bhqk,bkhd->bqhd', p, vh).reshape(B, S, D)
    a = a @ params['wo'] + params['bo']
    x1 = xn + a
    x2 = _layernorm(x1, params['ln2_g'], params['ln2_b'])
    h = x2 @ params['w1'] + params['b1']
    h = 0.5 * h * (1.0 + lax.erf(h * _INV_SQRT2))
    m = h @ params['w2'] + params['b2']
    return jnp.transpose(x1 + m, (1, 0, 2))


if __name__ == "__main__":
    S, B, D, H = 8, 2, 32, 4   # demo shapes (well below (8,128) tiling minimums; correctness only)

    key = jax.random.PRNGKey(0)
    kx, *kw = jax.random.split(key, 9)
    init = lambda k, shp: (0.02 * jax.random.normal(k, shp)).astype(jnp.float32)

    params = {
        'ln1_g': jnp.ones((1, D), jnp.float32),
        'ln1_b': jnp.zeros((1, D), jnp.float32),
        'ln2_g': jnp.ones((1, D), jnp.float32),
        'ln2_b': jnp.zeros((1, D), jnp.float32),
        'wqkv': init(kw[0], (D, 3 * D)),
        'bqkv': init(kw[1], (1, 3 * D)),
        'wo':   init(kw[2], (D, D)),
        'bo':   init(kw[3], (1, D)),
        'w1':   init(kw[4], (D, 4 * D)),
        'b1':   init(kw[5], (1, 4 * D)),
        'w2':   init(kw[6], (4 * D, D)),
        'b2':   init(kw[7], (1, D)),
    }

    x = jax.random.normal(kx, (S, B, D), dtype=jnp.float32)

    params_fast = prepare_block_params(params)          # one-time bf16 weight preparation
    out = jax.block_until_ready(transformer_block(x, params_fast, H))

    ref = jax.block_until_ready(reference_block(x, params, H))
    assert out.shape == (S, B, D)
    # bf16 matmul inputs / weights (f32 accumulation) => tolerance loosened vs. the f32 reference.
    assert jnp.allclose(out, ref, atol=2e-2, rtol=2e-2), "mismatch vs pure-JAX reference"

    print("KERNEL_OK")
</pallas_src>

<mosaic_0001>
module attributes {stable_mosaic.version = 11 : i64} {
  func.func @kernel(%arg0: i32, %arg1: memref<1x8x32xf32, #tpu.memory_space<vmem>>, %arg2: memref<1x32xf32, #tpu.memory_space<vmem>>, %arg3: memref<1x32xf32, #tpu.memory_space<vmem>>, %arg4: memref<32x96xbf16, #tpu.memory_space<vmem>>, %arg5: memref<1x96xf32, #tpu.memory_space<vmem>>, %arg6: memref<32x32xbf16, #tpu.memory_space<vmem>>, %arg7: memref<1x32xf32, #tpu.memory_space<vmem>>, %arg8: memref<1x32xf32, #tpu.memory_space<vmem>>, %arg9: memref<1x32xf32, #tpu.memory_space<vmem>>, %arg10: memref<32x128xbf16, #tpu.memory_space<vmem>>, %arg11: memref<1x128xf32, #tpu.memory_space<vmem>>, %arg12: memref<128x32xbf16, #tpu.memory_space<vmem>>, %arg13: memref<1x32xf32, #tpu.memory_space<vmem>>, %arg14: memref<1x8x32xf32, #tpu.memory_space<vmem>>, %arg15: memref<8x32xbf16, #tpu.memory_space<vmem>>) attributes {dimension_semantics = [#tpu.dimension_semantics<parallel>], iteration_bounds = array<i64: 2>, scalar_prefetch = 0 : i64, scratch_operands = 1 : i64, tpu.core_type = #tpu.core_type<tc>, window_params = [{transform_indices = @transform_0, window_bounds = array<i64: 1, 8, 32>}, {pipeline_mode = #tpu.pipeline_mode<synchronous>, transform_indices = @transform_1, window_bounds = array<i64: 1, 32>}, {pipeline_mode = #tpu.pipeline_mode<synchronous>, transform_indices = @transform_2, window_bounds = array<i64: 1, 32>}, {pipeline_mode = #tpu.pipeline_mode<synchronous>, transform_indices = @transform_3, window_bounds = array<i64: 32, 96>}, {pipeline_mode = #tpu.pipeline_mode<synchronous>, transform_indices = @transform_4, window_bounds = array<i64: 1, 96>}, {pipeline_mode = #tpu.pipeline_mode<synchronous>, transform_indices = @transform_5, window_bounds = array<i64: 32, 32>}, {pipeline_mode = #tpu.pipeline_mode<synchronous>, transform_indices = @transform_6, window_bounds = array<i64: 1, 32>}, {pipeline_mode = #tpu.pipeline_mode<synchronous>, transform_indices = @transform_7, window_bounds = array<i64: 1, 32>}, {pipeline_mode = #tpu.pipeline_mode<synchronous>, transform_indices = @transform_8, window_bounds = array<i64: 1, 32>}, {pipeline_mode = #tpu.pipeline_mode<synchronous>, transform_indices = @transform_9, window_bounds = array<i64: 32, 128>}, {pipeline_mode = #tpu.pipeline_mode<synchronous>, transform_indices = @transform_10, window_bounds = array<i64: 1, 128>}, {pipeline_mode = #tpu.pipeline_mode<synchronous>, transform_indices = @transform_11, window_bounds = array<i64: 128, 32>}, {pipeline_mode = #tpu.pipeline_mode<synchronous>, transform_indices = @transform_12, window_bounds = array<i64: 1, 32>}, {transform_indices = @transform_13, window_bounds = array<i64: 1, 8, 32>}]} {
    %c0 = arith.constant 0 : index
    %c0_0 = arith.constant 0 : index
    %c0_1 = arith.constant 0 : index
    %0 = vector.load %arg1[%c0, %c0_0, %c0_1] : memref<1x8x32xf32, #tpu.memory_space<vmem>>, vector<1x8x32xf32>
    %1 = vector.shape_cast %0 : vector<1x8x32xf32> to vector<8x32xf32>
    %c0_2 = arith.constant 0 : index
    %c0_3 = arith.constant 0 : index
    %2 = vector.load %arg2[%c0_2, %c0_3] : memref<1x32xf32, #tpu.memory_space<vmem>>, vector<1x32xf32>
    %c0_4 = arith.constant 0 : index
    %c0_5 = arith.constant 0 : index
    %3 = vector.load %arg3[%c0_4, %c0_5] : memref<1x32xf32, #tpu.memory_space<vmem>>, vector<1x32xf32>
    %cst = arith.constant dense<0.000000e+00> : vector<8xf32>
    %4 = vector.multi_reduction <add>, %1, %cst [1] : vector<8x32xf32> to vector<8xf32>
    %5 = vector.shape_cast %4 : vector<8xf32> to vector<8x1xf32>
    %cst_6 = arith.constant 3.200000e+01 : f32
    %6 = vector.broadcast %cst_6 : f32 to vector<8x1xf32>
    %7 = arith.divf %5, %6 : vector<8x1xf32>
    %8 = vector.broadcast %7 : vector<8x1xf32> to vector<8x32xf32>
    %9 = arith.subf %1, %8 : vector<8x32xf32>
    %10 = arith.mulf %9, %9 : vector<8x32xf32>
    %cst_7 = arith.constant dense<0.000000e+00> : vector<8xf32>
    %11 = vector.multi_reduction <add>, %10, %cst_7 [1] : vector<8x32xf32> to vector<8xf32>
    %12 = vector.shape_cast %11 : vector<8xf32> to vector<8x1xf32>
    %cst_8 = arith.constant 3.200000e+01 : f32
    %13 = vector.broadcast %cst_8 : f32 to vector<8x1xf32>
    %14 = arith.divf %12, %13 : vector<8x1xf32>
    %15 = vector.broadcast %7 : vector<8x1xf32> to vector<8x32xf32>
    %16 = arith.subf %1, %15 : vector<8x32xf32>
    %cst_9 = arith.constant 9.99999974E-6 : f32
    %17 = vector.broadcast %cst_9 : f32 to vector<8x1xf32>
    %18 = arith.addf %14, %17 : vector<8x1xf32>
    %19 = math.rsqrt %18 : vector<8x1xf32>
    %20 = vector.broadcast %19 : vector<8x1xf32> to vector<8x32xf32>
    %21 = arith.mulf %16, %20 : vector<8x32xf32>
    %22 = vector.broadcast %2 : vector<1x32xf32> to vector<8x32xf32>
    %23 = arith.mulf %21, %22 : vector<8x32xf32>
    %24 = vector.broadcast %3 : vector<1x32xf32> to vector<8x32xf32>
    %25 = arith.addf %23, %24 : vector<8x32xf32>
    %26 = arith.truncf %25 : vector<8x32xf32> to vector<8x32xbf16>
    %c0_10 = arith.constant 0 : index
    %c0_11 = arith.constant 0 : index
    %27 = vector.load %arg4[%c0_10, %c0_11] : memref<32x96xbf16, #tpu.memory_space<vmem>>, vector<32x96xbf16>
    %cst_12 = arith.constant dense<0.000000e+00> : vector<8x96xf32>
    %28 = tpu.matmul %26, %27, %cst_12 {dimension_numbers = #tpu.dot_dimension_numbers<[1], [0], [0], [1], [0, 0, 1, 1], [], []>} : vector<8x32xbf16>, vector<32x96xbf16>, vector<8x96xf32> -> vector<8x96xf32>
    %c0_13 = arith.constant 0 : index
    %c0_14 = arith.constant 0 : index
    %29 = vector.load %arg5[%c0_13, %c0_14] : memref<1x96xf32, #tpu.memory_space<vmem>>, vector<1x96xf32>
    %30 = vector.broadcast %29 : vector<1x96xf32> to vector<8x96xf32>
    %31 = arith.addf %28, %30 : vector<8x96xf32>
    %32 = vector.extract_strided_slice %31 {offsets = [0, 0], sizes = [8, 32], strides = [1, 1]} : vector<8x96xf32> to vector<8x32xf32>
    %cst_15 = arith.constant 0.353553385 : f32
    %33 = vector.broadcast %cst_15 : f32 to vector<8x32xf32>
    %34 = arith.mulf %32, %33 : vector<8x32xf32>
    %35 = arith.truncf %34 : vector<8x32xf32> to vector<8x32xbf16>
    %36 = vector.extract_strided_slice %31 {offsets = [0, 32], sizes = [8, 32], strides = [1, 1]} : vector<8x96xf32> to vector<8x32xf32>
    %37 = arith.truncf %36 : vector<8x32xf32> to vector<8x32xbf16>
    %38 = vector.extract_strided_slice %31 {offsets = [0, 64], sizes = [8, 32], strides = [1, 1]} : vector<8x96xf32> to vector<8x32xf32>
    %39 = arith.truncf %38 : vector<8x32xf32> to vector<8x32xbf16>
    %40 = tpu.iota {dimensions = array<i32: 0>} : vector<8x8xi32>
    %41 = tpu.iota {dimensions = array<i32: 1>} : vector<8x8xi32>
    %42 = arith.cmpi sgt, %41, %40 : vector<8x8xi32>
    %cst_16 = arith.constant 0xFF800000 : f32
    %cst_17 = arith.constant 0.000000e+00 : f32
    %43 = vector.broadcast %cst_16 : f32 to vector<8x8xf32>
    %44 = vector.broadcast %cst_17 : f32 to vector<8x8xf32>
    %45 = arith.select %42, %43, %44 : vector<8x8xi1>, vector<8x8xf32>
    %46 = vector.extract_strided_slice %35 {offsets = [0, 0], sizes = [8, 8], strides = [1, 1]} : vector<8x32xbf16> to vector<8x8xbf16>
    %47 = vector.extract_strided_slice %37 {offsets = [0, 0], sizes = [8, 8], strides = [1, 1]} : vector<8x32xbf16> to vector<8x8xbf16>
    %48 = vector.extract_strided_slice %39 {offsets = [0, 0], sizes = [8, 8], strides = [1, 1]} : vector<8x32xbf16> to vector<8x8xbf16>
    %cst_18 = arith.constant dense<0.000000e+00> : vector<8x8xf32>
    %49 = tpu.matmul %46, %47, %cst_18 {dimension_numbers = #tpu.dot_dimension_numbers<[1], [1], [0], [0], [0, 0, 1, 0], [], []>} : vector<8x8xbf16>, vector<8x8xbf16>, vector<8x8xf32> -> vector<8x8xf32>
    %50 = arith.addf %49, %45 : vector<8x8xf32>
    %cst_19 = arith.constant dense<0xFF800000> : vector<8xf32>
    %51 = vector.multi_reduction <maximumf>, %50, %cst_19 [1] : vector<8x8xf32> to vector<8xf32>
    %52 = vector.shape_cast %51 : vector<8xf32> to vector<8x1xf32>
    %53 = vector.broadcast %52 : vector<8x1xf32> to vector<8x8xf32>
    %54 = arith.subf %50, %53 : vector<8x8xf32>
    %55 = math.exp %54 : vector<8x8xf32>
    %cst_20 = arith.constant dense<0.000000e+00> : vector<8xf32>
    %56 = vector.multi_reduction <add>, %55, %cst_20 [1] : vector<8x8xf32> to vector<8xf32>
    %57 = vector.shape_cast %56 : vector<8xf32> to vector<8x1xf32>
    %58 = arith.truncf %55 : vector<8x8xf32> to vector<8x8xbf16>
    %cst_21 = arith.constant dense<0.000000e+00> : vector<8x8xf32>
    %59 = tpu.matmul %58, %48, %cst_21 {dimension_numbers = #tpu.dot_dimension_numbers<[1], [0], [0], [1], [0, 0, 1, 1], [], []>} : vector<8x8xbf16>, vector<8x8xbf16>, vector<8x8xf32> -> vector<8x8xf32>
    %60 = vector.broadcast %57 : vector<8x1xf32> to vector<8x8xf32>
    %61 = arith.divf %59, %60 : vector<8x8xf32>
    %62 = arith.truncf %61 : vector<8x8xf32> to vector<8x8xbf16>
    %c0_22 = arith.constant 0 : index
    %c0_23 = arith.constant 0 : index
    %63 = vector.load %arg15[%c0_22, %c0_23] : memref<8x32xbf16, #tpu.memory_space<vmem>>, vector<8x8xbf16>
    tpu.vector_store %arg15[%c0_22, %c0_23], %62 {strides = array<i32>} : memref<8x32xbf16, #tpu.memory_space<vmem>>, vector<8x8xbf16>,
    %64 = vector.extract_strided_slice %35 {offsets = [0, 8], sizes = [8, 8], strides = [1, 1]} : vector<8x32xbf16> to vector<8x8xbf16>
    %65 = vector.extract_strided_slice %37 {offsets = [0, 8], sizes = [8, 8], strides = [1, 1]} : vector<8x32xbf16> to vector<8x8xbf16>
    %66 = vector.extract_strided_slice %39 {offsets = [0, 8], sizes = [8, 8], strides = [1, 1]} : vector<8x32xbf16> to vector<8x8xbf16>
    %cst_24 = arith.constant dense<0.000000e+00> : vector<8x8xf32>
    %67 = tpu.matmul %64, %65, %cst_24 {dimension_numbers = #tpu.dot_dimension_numbers<[1], [1], [0], [0], [0, 0, 1, 0], [], []>} : vector<8x8xbf16>, vector<8x8xbf16>, vector<8x8xf32> -> vector<8x8xf32>
    %68 = arith.addf %67, %45 : vector<8x8xf32>
    %cst_25 = arith.constant dense<0xFF800000> : vector<8xf32>
    %69 = vector.multi_reduction <maximumf>, %68, %cst_25 [1] : vector<8x8xf32> to vector<8xf32>
    %70 = vector.shape_cast %69 : vector<8xf32> to vector<8x1xf32>
    %71 = vector.broadcast %70 : vector<8x1xf32> to vector<8x8xf32>
    %72 = arith.subf %68, %71 : vector<8x8xf32>
    %73 = math.exp %72 : vector<8x8xf32>
    %cst_26 = arith.constant dense<0.000000e+00> : vector<8xf32>
    %74 = vector.multi_reduction <add>, %73, %cst_26 [1] : vector<8x8xf32> to vector<8xf32>
    %75 = vector.shape_cast %74 : vector<8xf32> to vector<8x1xf32>
    %76 = arith.truncf %73 : vector<8x8xf32> to vector<8x8xbf16>
    %cst_27 = arith.constant dense<0.000000e+00> : vector<8x8xf32>
    %77 = tpu.matmul %76, %66, %cst_27 {dimension_numbers = #tpu.dot_dimension_numbers<[1], [0], [0], [1], [0, 0, 1, 1], [], []>} : vector<8x8xbf16>, vector<8x8xbf16>, vector<8x8xf32> -> vector<8x8xf32>
    %78 = vector.broadcast %75 : vector<8x1xf32> to vector<8x8xf32>
    %79 = arith.divf %77, %78 : vector<8x8xf32>
    %80 = arith.truncf %79 : vector<8x8xf32> to vector<8x8xbf16>
    %c0_28 = arith.constant 0 : index
    %c8 = arith.constant 8 : index
    %81 = vector.load %arg15[%c0_28, %c8] : memref<8x32xbf16, #tpu.memory_space<vmem>>, vector<8x8xbf16>
    tpu.vector_store %arg15[%c0_28, %c8], %80 {strides = array<i32>} : memref<8x32xbf16, #tpu.memory_space<vmem>>, vector<8x8xbf16>,
    %82 = vector.extract_strided_slice %35 {offsets = [0, 16], sizes = [8, 8], strides = [1, 1]} : vector<8x32xbf16> to vector<8x8xbf16>
    %83 = vector.extract_strided_slice %37 {offsets = [0, 16], sizes = [8, 8], strides = [1, 1]} : vector<8x32xbf16> to vector<8x8xbf16>
    %84 = vector.extract_strided_slice %39 {offsets = [0, 16], sizes = [8, 8], strides = [1, 1]} : vector<8x32xbf16> to vector<8x8xbf16>
    %cst_29 = arith.constant dense<0.000000e+00> : vector<8x8xf32>
    %85 = tpu.matmul %82, %83, %cst_29 {dimension_numbers = #tpu.dot_dimension_numbers<[1], [1], [0], [0], [0, 0, 1, 0], [], []>} : vector<8x8xbf16>, vector<8x8xbf16>, vector<8x8xf32> -> vector<8x8xf32>
    %86 = arith.addf %85, %45 : vector<8x8xf32>
    %cst_30 = arith.constant dense<0xFF800000> : vector<8xf32>
    %87 = vector.multi_reduction <maximumf>, %86, %cst_30 [1] : vector<8x8xf32> to vector<8xf32>
    %88 = vector.shape_cast %87 : vector<8xf32> to vector<8x1xf32>
    %89 = vector.broadcast %88 : vector<8x1xf32> to vector<8x8xf32>
    %90 = arith.subf %86, %89 : vector<8x8xf32>
    %91 = math.exp %90 : vector<8x8xf32>
    %cst_31 = arith.constant dense<0.000000e+00> : vector<8xf32>
    %92 = vector.multi_reduction <add>, %91, %cst_31 [1] : vector<8x8xf32> to vector<8xf32>
    %93 = vector.shape_cast %92 : vector<8xf32> to vector<8x1xf32>
    %94 = arith.truncf %91 : vector<8x8xf32> to vector<8x8xbf16>
    %cst_32 = arith.constant dense<0.000000e+00> : vector<8x8xf32>
    %95 = tpu.matmul %94, %84, %cst_32 {dimension_numbers = #tpu.dot_dimension_numbers<[1], [0], [0], [1], [0, 0, 1, 1], [], []>} : vector<8x8xbf16>, vector<8x8xbf16>, vector<8x8xf32> -> vector<8x8xf32>
    %96 = vector.broadcast %93 : vector<8x1xf32> to vector<8x8xf32>
    %97 = arith.divf %95, %96 : vector<8x8xf32>
    %98 = arith.truncf %97 : vector<8x8xf32> to vector<8x8xbf16>
    %c0_33 = arith.constant 0 : index
    %c16 = arith.constant 16 : index
    %99 = vector.load %arg15[%c0_33, %c16] : memref<8x32xbf16, #tpu.memory_space<vmem>>, vector<8x8xbf16>
    tpu.vector_store %arg15[%c0_33, %c16], %98 {strides = array<i32>} : memref<8x32xbf16, #tpu.memory_space<vmem>>, vector<8x8xbf16>,
    %100 = vector.extract_strided_slice %35 {offsets = [0, 24], sizes = [8, 8], strides = [1, 1]} : vector<8x32xbf16> to vector<8x8xbf16>
    %101 = vector.extract_strided_slice %37 {offsets = [0, 24], sizes = [8, 8], strides = [1, 1]} : vector<8x32xbf16> to vector<8x8xbf16>
    %102 = vector.extract_strided_slice %39 {offsets = [0, 24], sizes = [8, 8], strides = [1, 1]} : vector<8x32xbf16> to vector<8x8xbf16>
    %cst_34 = arith.constant dense<0.000000e+00> : vector<8x8xf32>
    %103 = tpu.matmul %100, %101, %cst_34 {dimension_numbers = #tpu.dot_dimension_numbers<[1], [1], [0], [0], [0, 0, 1, 0], [], []>} : vector<8x8xbf16>, vector<8x8xbf16>, vector<8x8xf32> -> vector<8x8xf32>
    %104 = arith.addf %103, %45 : vector<8x8xf32>
    %cst_35 = arith.constant dense<0xFF800000> : vector<8xf32>
    %105 = vector.multi_reduction <maximumf>, %104, %cst_35 [1] : vector<8x8xf32> to vector<8xf32>
    %106 = vector.shape_cast %105 : vector<8xf32> to vector<8x1xf32>
    %107 = vector.broadcast %106 : vector<8x1xf32> to vector<8x8xf32>
    %108 = arith.subf %104, %107 : vector<8x8xf32>
    %109 = math.exp %108 : vector<8x8xf32>
    %cst_36 = arith.constant dense<0.000000e+00> : vector<8xf32>
    %110 = vector.multi_reduction <add>, %109, %cst_36 [1] : vector<8x8xf32> to vector<8xf32>
    %111 = vector.shape_cast %110 : vector<8xf32> to vector<8x1xf32>
    %112 = arith.truncf %109 : vector<8x8xf32> to vector<8x8xbf16>
    %cst_37 = arith.constant dense<0.000000e+00> : vector<8x8xf32>
    %113 = tpu.matmul %112, %102, %cst_37 {dimension_numbers = #tpu.dot_dimension_numbers<[1], [0], [0], [1], [0, 0, 1, 1], [], []>} : vector<8x8xbf16>, vector<8x8xbf16>, vector<8x8xf32> -> vector<8x8xf32>
    %114 = vector.broadcast %111 : vector<8x1xf32> to vector<8x8xf32>
    %115 = arith.divf %113, %114 : vector<8x8xf32>
    %116 = arith.truncf %115 : vector<8x8xf32> to vector<8x8xbf16>
    %c0_38 = arith.constant 0 : index
    %c24 = arith.constant 24 : index
    %117 = vector.load %arg15[%c0_38, %c24] : memref<8x32xbf16, #tpu.memory_space<vmem>>, vector<8x8xbf16>
    tpu.vector_store %arg15[%c0_38, %c24], %116 {strides = array<i32>} : memref<8x32xbf16, #tpu.memory_space<vmem>>, vector<8x8xbf16>,
    %c0_39 = arith.constant 0 : index
    %c0_40 = arith.constant 0 : index
    %118 = vector.load %arg15[%c0_39, %c0_40] : memref<8x32xbf16, #tpu.memory_space<vmem>>, vector<8x32xbf16>
    %c0_41 = arith.constant 0 : index
    %c0_42 = arith.constant 0 : index
    %119 = vector.load %arg6[%c0_41, %c0_42] : memref<32x32xbf16, #tpu.memory_space<vmem>>, vector<32x32xbf16>
    %cst_43 = arith.constant dense<0.000000e+00> : vector<8x32xf32>
    %120 = tpu.matmul %118, %119, %cst_43 {dimension_numbers = #tpu.dot_dimension_numbers<[1], [0], [0], [1], [0, 0, 1, 1], [], []>} : vector<8x32xbf16>, vector<32x32xbf16>, vector<8x32xf32> -> vector<8x32xf32>
    %c0_44 = arith.constant 0 : index
    %c0_45 = arith.constant 0 : index
    %121 = vector.load %arg7[%c0_44, %c0_45] : memref<1x32xf32, #tpu.memory_space<vmem>>, vector<1x32xf32>
    %122 = vector.broadcast %121 : vector<1x32xf32> to vector<8x32xf32>
    %123 = arith.addf %120, %122 : vector<8x32xf32>
    %124 = arith.addf %25, %123 : vector<8x32xf32>
    %c0_46 = arith.constant 0 : index
    %c0_47 = arith.constant 0 : index
    %125 = vector.load %arg8[%c0_46, %c0_47] : memref<1x32xf32, #tpu.memory_space<vmem>>, vector<1x32xf32>
    %c0_48 = arith.constant 0 : index
    %c0_49 = arith.constant 0 : index
    %126 = vector.load %arg9[%c0_48, %c0_49] : memref<1x32xf32, #tpu.memory_space<vmem>>, vector<1x32xf32>
    %cst_50 = arith.constant dense<0.000000e+00> : vector<8xf32>
    %127 = vector.multi_reduction <add>, %124, %cst_50 [1] : vector<8x32xf32> to vector<8xf32>
    %128 = vector.shape_cast %127 : vector<8xf32> to vector<8x1xf32>
    %cst_51 = arith.constant 3.200000e+01 : f32
    %129 = vector.broadcast %cst_51 : f32 to vector<8x1xf32>
    %130 = arith.divf %128, %129 : vector<8x1xf32>
    %131 = vector.broadcast %130 : vector<8x1xf32> to vector<8x32xf32>
    %132 = arith.subf %124, %131 : vector<8x32xf32>
    %133 = arith.mulf %132, %132 : vector<8x32xf32>
    %cst_52 = arith.constant dense<0.000000e+00> : vector<8xf32>
    %134 = vector.multi_reduction <add>, %133, %cst_52 [1] : vector<8x32xf32> to vector<8xf32>
    %135 = vector.shape_cast %134 : vector<8xf32> to vector<8x1xf32>
    %cst_53 = arith.constant 3.200000e+01 : f32
    %136 = vector.broadcast %cst_53 : f32 to vector<8x1xf32>
    %137 = arith.divf %135, %136 : vector<8x1xf32>
    %138 = vector.broadcast %130 : vector<8x1xf32> to vector<8x32xf32>
    %139 = arith.subf %124, %138 : vector<8x32xf32>
    %cst_54 = arith.constant 9.99999974E-6 : f32
    %140 = vector.broadcast %cst_54 : f32 to vector<8x1xf32>
    %141 = arith.addf %137, %140 : vector<8x1xf32>
    %142 = math.rsqrt %141 : vector<8x1xf32>
    %143 = vector.broadcast %142 : vector<8x1xf32> to vector<8x32xf32>
    %144 = arith.mulf %139, %143 : vector<8x32xf32>
    %145 = vector.broadcast %125 : vector<1x32xf32> to vector<8x32xf32>
    %146 = arith.mulf %144, %145 : vector<8x32xf32>
    %147 = vector.broadcast %126 : vector<1x32xf32> to vector<8x32xf32>
    %148 = arith.addf %146, %147 : vector<8x32xf32>
    %149 = arith.truncf %148 : vector<8x32xf32> to vector<8x32xbf16>
    %c0_55 = arith.constant 0 : index
    %c0_56 = arith.constant 0 : index
    %150 = vector.load %arg10[%c0_55, %c0_56] : memref<32x128xbf16, #tpu.memory_space<vmem>>, vector<32x128xbf16>
    %cst_57 = arith.constant dense<0.000000e+00> : vector<8x128xf32>
    %151 = tpu.matmul %149, %150, %cst_57 {dimension_numbers = #tpu.dot_dimension_numbers<[1], [0], [0], [1], [0, 0, 1, 1], [], []>} : vector<8x32xbf16>, vector<32x128xbf16>, vector<8x128xf32> -> vector<8x128xf32>
    %c0_58 = arith.constant 0 : index
    %c0_59 = arith.constant 0 : index
    %152 = vector.load %arg11[%c0_58, %c0_59] : memref<1x128xf32, #tpu.memory_space<vmem>>, vector<1x128xf32>
    %153 = vector.broadcast %152 : vector<1x128xf32> to vector<8x128xf32>
    %154 = arith.addf %151, %153 : vector<8x128xf32>
    %cst_60 = arith.constant 5.000000e-01 : f32
    %155 = vector.broadcast %cst_60 : f32 to vector<8x128xf32>
    %156 = arith.mulf %155, %154 : vector<8x128xf32>
    %cst_61 = arith.constant 0.707106769 : f32
    %157 = vector.broadcast %cst_61 : f32 to vector<8x128xf32>
    %158 = arith.mulf %154, %157 : vector<8x128xf32>
    %159 = math.erf %158 : vector<8x128xf32>
    %cst_62 = arith.constant 1.000000e+00 : f32
    %160 = vector.broadcast %cst_62 : f32 to vector<8x128xf32>
    %161 = arith.addf %160, %159 : vector<8x128xf32>
    %162 = arith.mulf %156, %161 : vector<8x128xf32>
    %163 = arith.truncf %162 : vector<8x128xf32> to vector<8x128xbf16>
    %c0_63 = arith.constant 0 : index
    %c0_64 = arith.constant 0 : index
    %164 = vector.load %arg12[%c0_63, %c0_64] : memref<128x32xbf16, #tpu.memory_space<vmem>>, vector<128x32xbf16>
    %cst_65 = arith.constant dense<0.000000e+00> : vector<8x32xf32>
    %165 = tpu.matmul %163, %164, %cst_65 {dimension_numbers = #tpu.dot_dimension_numbers<[1], [0], [0], [1], [0, 0, 1, 1], [], []>} : vector<8x128xbf16>, vector<128x32xbf16>, vector<8x32xf32> -> vector<8x32xf32>
    %c0_66 = arith.constant 0 : index
    %c0_67 = arith.constant 0 : index
    %166 = vector.load %arg13[%c0_66, %c0_67] : memref<1x32xf32, #tpu.memory_space<vmem>>, vector<1x32xf32>
    %167 = vector.broadcast %166 : vector<1x32xf32> to vector<8x32xf32>
    %168 = arith.addf %165, %167 : vector<8x32xf32>
    %169 = arith.addf %124, %168 : vector<8x32xf32>
    %c0_68 = arith.constant 0 : index
    %c0_69 = arith.constant 0 : index
    %c0_70 = arith.constant 0 : index
    %170 = vector.load %arg14[%c0_68, %c0_69, %c0_70] : memref<1x8x32xf32, #tpu.memory_space<vmem>>, vector<1x8x32xf32>
    %171 = vector.shape_cast %170 : vector<1x8x32xf32> to vector<8x32xf32>
    %172 = vector.shape_cast %169 : vector<8x32xf32> to vector<1x8x32xf32>
    tpu.vector_store %arg14[%c0_68, %c0_69, %c0_70], %172 {strides = array<i32>} : memref<1x8x32xf32, #tpu.memory_space<vmem>>, vector<1x8x32xf32>,
    return
  }
  func.func @transform_0(%arg0: i32) -> (i32, i32, i32) {
    %c0_i32 = arith.constant 0 : i32
    %c0_i32_0 = arith.constant 0 : i32
    %c0_i32_1 = arith.constant 0 : i32
    return %arg0, %c0_i32, %c0_i32_0 : i32, i32, i32
  }
  func.func @transform_1(%arg0: i32) -> (i32, i32) {
    %c0_i32 = arith.constant 0 : i32
    %c0_i32_0 = arith.constant 0 : i32
    %c0_i32_1 = arith.constant 0 : i32
    return %c0_i32, %c0_i32_0 : i32, i32
  }
  func.func @transform_2(%arg0: i32) -> (i32, i32) {
    %c0_i32 = arith.constant 0 : i32
    %c0_i32_0 = arith.constant 0 : i32
    %c0_i32_1 = arith.constant 0 : i32
    return %c0_i32, %c0_i32_0 : i32, i32
  }
  func.func @transform_3(%arg0: i32) -> (i32, i32) {
    %c0_i32 = arith.constant 0 : i32
    %c0_i32_0 = arith.constant 0 : i32
    %c0_i32_1 = arith.constant 0 : i32
    return %c0_i32, %c0_i32_0 : i32, i32
  }
  func.func @transform_4(%arg0: i32) -> (i32, i32) {
    %c0_i32 = arith.constant 0 : i32
    %c0_i32_0 = arith.constant 0 : i32
    %c0_i32_1 = arith.constant 0 : i32
    return %c0_i32, %c0_i32_0 : i32, i32
  }
  func.func @transform_5(%arg0: i32) -> (i32, i32) {
    %c0_i32 = arith.constant 0 : i32
    %c0_i32_0 = arith.constant 0 : i32
    %c0_i32_1 = arith.constant 0 : i32
    return %c0_i32, %c0_i32_0 : i32, i32
  }
  func.func @transform_6(%arg0: i32) -> (i32, i32) {
    %c0_i32 = arith.constant 0 : i32
    %c0_i32_0 = arith.constant 0 : i32
    %c0_i32_1 = arith.constant 0 : i32
    return %c0_i32, %c0_i32_0 : i32, i32
  }
  func.func @transform_7(%arg0: i32) -> (i32, i32) {
    %c0_i32 = arith.constant 0 : i32
    %c0_i32_0 = arith.constant 0 : i32
    %c0_i32_1 = arith.constant 0 : i32
    return %c0_i32, %c0_i32_0 : i32, i32
  }
  func.func @transform_8(%arg0: i32) -> (i32, i32) {
    %c0_i32 = arith.constant 0 : i32
    %c0_i32_0 = arith.constant 0 : i32
    %c0_i32_1 = arith.constant 0 : i32
    return %c0_i32, %c0_i32_0 : i32, i32
  }
  func.func @transform_9(%arg0: i32) -> (i32, i32) {
    %c0_i32 = arith.constant 0 : i32
    %c0_i32_0 = arith.constant 0 : i32
    %c0_i32_1 = arith.constant 0 : i32
    return %c0_i32, %c0_i32_0 : i32, i32
  }
  func.func @transform_10(%arg0: i32) -> (i32, i32) {
    %c0_i32 = arith.constant 0 : i32
    %c0_i32_0 = arith.constant 0 : i32
    %c0_i32_1 = arith.constant 0 : i32
    return %c0_i32, %c0_i32_0 : i32, i32
  }
  func.func @transform_11(%arg0: i32) -> (i32, i32) {
    %c0_i32 = arith.constant 0 : i32
    %c0_i32_0 = arith.constant 0 : i32
    %c0_i32_1 = arith.constant 0 : i32
    return %c0_i32, %c0_i32_0 : i32, i32
  }
  func.func @transform_12(%arg0: i32) -> (i32, i32) {
    %c0_i32 = arith.constant 0 : i32
    %c0_i32_0 = arith.constant 0 : i32
    %c0_i32_1 = arith.constant 0 : i32
    return %c0_i32, %c0_i32_0 : i32, i32
  }
  func.func @transform_13(%arg0: i32) -> (i32, i32, i32) {
    %c0_i32 = arith.constant 0 : i32
    %c0_i32_0 = arith.constant 0 : i32
    %c0_i32_1 = arith.constant 0 : i32
    return %arg0, %c0_i32, %c0_i32_0 : i32, i32, i32
  }
}

</mosaic_0001>

<bundles_post_ra>
// kernel: tpu_custom_call.1
= control target key start
LH: loop header
LB: loop body
LE: loop exit
PB: predicated region body
PF: predicated region fallthrough
CT: control target
= control target key end

     0   :  { %s2052_s0 = inlined_call_operand.vmem [shape: f32[2,8,32], index: 0, kind: input, shape index: {}]   ;;  %s2053_s1 = inlined_call_operand.vmem [shape: f32[1,32], index: 1, kind: input, shape index: {}]   ;;  %s2054_s2 = inlined_call_operand.vmem [shape: f32[1,32], index: 2, kind: input, shape index: {}]   ;;  %s2055_s3 = inlined_call_operand.vmem [shape: bf16[32,96], index: 3, kind: input, shape index: {}]   ;;  %s2056_s4 = inlined_call_operand.vmem [shape: f32[1,96], index: 4, kind: input, shape index: {}]   ;;  %s2057_s5 = inlined_call_operand.vmem [shape: bf16[32,32], index: 5, kind: input, shape index: {}]   ;;  %s2058_s6 = inlined_call_operand.vmem [shape: f32[1,32], index: 6, kind: input, shape index: {}]   ;;  %s2059_s7 = inlined_call_operand.vmem [shape: f32[1,32], index: 7, kind: input, shape index: {}]   ;;  %s2060_s8 = inlined_call_operand.vmem [shape: f32[1,32], index: 8, kind: input, shape index: {}]   ;;  %s2061_s9 = inlined_call_operand.vmem [shape: bf16[32,128], index: 9, kind: input, shape index: {}]   ;;  %s2062_s10 = inlined_call_operand.vmem [shape: f32[1,128], index: 10, kind: input, shape index: {}]   ;;  %s2063_s11 = inlined_call_operand.vmem [shape: bf16[128,32], index: 11, kind: input, shape index: {}]   ;;  %s2064_s12 = inlined_call_operand.vmem [shape: f32[1,32], index: 12, kind: input, shape index: {}]   ;;  %s2065_s13 = inlined_call_operand.hbm [shape: f32[2,8,32], index: 13, kind: output, shape index: {}]  }
   0x1   :  { %2066 = sst [smem:[#allocation6_spill]] %s2052_s0 }
   0x2   :  { %2067 = sst [smem:[#allocation7_spill]] %s2053_s1 }
   0x3   :  { %2068 = sst [smem:[#allocation8_spill]] %s2054_s2 }
   0x4   :  { %18 = vsyncpa [#allocation4], 0 }
   0x5   :  { %20 = vsyncpa [#allocation4 + $0x1], 0  ;;  %s1788_s25 = smov 0   ;;  %s1790_s26 = smov 0  }
   0x6   :  { %s1792_s27 = smov 0   ;;  %s1794_s28 = smov 0  }
   0x7 LB: > { %s1809_s29 = sadd.s32 4294967295, %s1699_s28   ;;  %s1373_s30 = sadd.s32 4294967294, %s1699_s28   ;;  %s1699_s28 = sphi %s1794_s28, %s2077_s28   ;;  %s1695_s27 = sphi %s1792_s27, %s2076_s27   ;;  %s1691_s26 = sphi %s1790_s26, %s2075_s26   ;;  %s1687_s25 = sphi %s1788_s25, %s2074_s25  }
   0x8   : > { %s1813_s14 = sadd.s32 1, %s1699_s28   ;;  %s311_s15 = sadd.s32 1, %s1695_s27 }
   0x9   : > { %s308_s16 = ssub.s32 %s1699_s28, %s1813_s14  ;;  %p321_p0 = scmp.ne.s32.totalorder %s1695_s27, %s1691_s26 }
   0xa   : > { %p309_p1 = scmp.eq.s32.totalorder %s308_s16, 0  ;;  %p322_p2 = scmp.eq.s32.totalorder %s1809_s29, 1 }
   0xb   : > { %p327_p3 = scmp.ne.s32.totalorder %s1691_s26, %s1687_s25  ;;  %p328_p4 = scmp.eq.s32.totalorder %s1373_s30, 1 }
   0xc   : > { %s1824_s17 = scalar_select %p309_p1, %s1695_s27, %s311_s15  }
   0xd   : > { %p1826_p5 = por %p322_p2, %p321_p0  ;;  %p1830_p6 = por %p328_p4, %p327_p3 }
   0xe   : > { %p1376_p7 = scmp.ge.s32.totalorder %s1699_s28, 1  ;;  %p389_p8 = scmp.lt.s32.totalorder %s1699_s28, 3 }
  0x10   : > { %p390_p9 = pnand %p1376_p7, %p389_p8 }
  0x11   : > { %p432_p10 = scmp.lt.s32.totalorder (!%p390_p9), %s1809_s29, 1  ;;  %s2071_s0 = sld [smem:[#allocation6_spill]] (!%p390_p9) }
  0x12   : > { %393 = sbr.rel (%p390_p9) target bundleno = 2328 (0x918), region = 72  ;;  %s2072_s1 = sld [smem:[#allocation7_spill]] (!%p390_p9) }
  0x13   : > { %s2073_s2 = sld [smem:[#allocation8_spill]] (!%p390_p9)  ;;  %s1703_s16 = smov (!%p390_p9), 96  }
  0x14   : > { %s1706_s22 = smov (!%p390_p9), 80   ;;  %s1707_s23 = smov (!%p390_p9), 112  }
  0x15   : > { %s1709_s30 = smov (!%p390_p9), 104   ;;  %s1710_s15 = smov (!%p390_p9), 64  }
  0x17   : > { %s433_s20 = scalar_select %p432_p10, %s1809_s29, 1  ;;  %vm440_vm0 = vcmask 261120   ;;  %v1603_v7 = vld [vmem:[%s2055_s3 + $0x8] sm:$0xff]   ;;  %v1701_v8 = vmov 0.0   ;;  %vm1702_vm1 = vmmov 0   ;;  %v1604_v9 = vld [vmem:[%s2055_s3] sm:$0xff]   ;;  %v539_v40 = vlaneseq }
  0x18   : > { %1456 = vmatprep.subr.bf16.mxu0 %v1701_v8  ;;  %1460 = vmatprep.mubr.msk.bf16.mxu0 %vm1702_vm1, %v1701_v8  ;;  %v1379_v14 = vld [vmem:[%s2072_s1] ss:$0 sm:$0xff]  ;;  %vm548_vm2 = vcmask 64512   ;;  %vm610_vm4 = vcmask 1043456   ;;  %vm657_vm5 = vcmask 60416   ;;  %vm777_vm6 = vcmask 126016  }
  0x19   : > { %s1378_s21 = sshll.u32 %s433_s20, 3  ;;  %1457 = vmatpush3.bf16.msra.mxu0 %v1603_v7  ;;  %1476 = vmatprep.subr.bf16.mxu1 %v1701_v8  ;;  %v1380_v16 = vld [vmem:[%s2073_s2] ss:$0 sm:$0xff]  ;;  %s1704_s20 = smov 120   ;;  %v540_v41 = vshrl.u32 %v539_v40, 7  ;;  %v542_v42 = vand.u32 127, %v539_v40 }
  0x1a   : > { %s435_s24 = scalar_lea.vmem %s2071_s0, %s1378_s21  ;;  %1458 = vmatprep.subr.bf16.mxu0 %v1701_v8  ;;  %1478 = vmatprep.mubr.msk.bf16.mxu1 %vm1702_vm1, %v1701_v8  ;;  %v1381_v20 = vld [vmem:[%s2056_s4] ss:$0 sm:$0xff]  ;;  %s1705_s21 = smov 88   ;;  %vm896_vm7 = vcmask 191616   ;;  %vm1015_vm8 = vcmask 257216  }
  0x1b   : > { %v437_v0 = vld [vmem:[%s435_s24] sm:$0xff]  ;;  %s1708_s24 = smov 72   ;;  %vm543_vm3 = vcmp.gt.s32.totalorder %v542_v42, %v540_v41 }
  0x1c   : > { %v441_v1 = vsel %vm440_vm0, %v437_v0, 0.0  ;;  %v544_v43 = vsel %vm543_vm3, -inf, %v1701_v8 }
  0x1d   : > { %442 = vadd.xlane.f32.xlu0 %v441_v1  ;;  %1459 = vmatpush3.bf16.msra.mxu0 %v1604_v9 }
  0x1e   : > { %1464 = vmatprep.subr.bf16.mxu0 %v1701_v8 }
  0xa6   : > { %v443_v2 = vpop.xlane.xlu0 %442 }
  0xa7   : > { %v445_v3 = vmul.f32 0.03125, %v443_v2 }
  0xa9   : > { %v446_v4 = vsub.f32 %v437_v0, %v445_v3 }
  0xab   : > { %v447_v5 = vmul.f32 %v446_v4, %v446_v4 }
  0xad   : > { %v448_v6 = vsel %vm440_vm0, %v447_v5, 0.0 }
  0xae   : > { %449 = vadd.xlane.f32.xlu0 %v448_v6 }
 0x137   : > { %v450_v10 = vpop.xlane.xlu0 %449 }
 0x138   : > { %v451_v11 = vmul.f32 0.03125, %v450_v10 }
 0x13a   : > { %v452_v12 = vadd.f32 1e-05, %v451_v11 }
 0x13c   : > { %1617 = vrsqrt.f32 %v452_v12 }
 0x149   : > { %v1618_v13 = vpop.eup %1617 }
 0x14a   : > { %v454_v15 = vmul.f32 %v1618_v13, %v446_v4 }
 0x14c   : > { %v461_v17 = vmul.f32 %v1379_v14, %v454_v15 }
 0x14e   : > { %v1863_v18 = vadd.f32 %v1380_v16, %v461_v17 }
 0x150   : > { %v469_v19 = vpack.c.bf16 %v1863_v18, %v1863_v18 }
 0x152   : > { %1461 = vmatmul.mubr.msk.bf16.vlgmr.msra.gmra.mxu0 %vm440_vm0, %v469_v19 }
 0x153   : > { %1466 = vmatprep.mubr.msk.bf16.mxu0 %vm1702_vm1, %v1701_v8 }
 0x212   : > { %v530_v21 = vpop.f32.mrf.mxu0 }
 0x213   : > { %v531_v22 = vadd.f32 %v1381_v20, %v530_v21 }
 0x214   : > { %v1462_v23 = vpop.f32.mrf.mxu0 }
 0x215   : > { %v536_v24 = vmul.f32 0.35355338, %v531_v22  ;;  %v1873_v25 = vpack.c.bf16 %v531_v22, %v531_v22 }
 0x216   : > { %v533_v26 = vpop.f32.mrf.mxu0 }
 0x217   : > { %v537_v27 = vpack.c.bf16 %v536_v24, %v536_v24  ;;  %546 = vrot.lane.b32.xlu1 %v1873_v25, %s1703_s16  ;;  %s1711_s16 = smov 56  }
 0x218   : > { %v1463_v28 = vpop.f32.mrf.mxu0 }
 0x219   : > { %660 = vrot.lane.b32.xlu0 %v537_v27, %s1704_s20  ;;  %s1712_s20 = smov 48  }
 0x21b   : > { %662 = vrot.lane.b32.xlu1 %v1873_v25, %s1705_s21  ;;  %s1713_s21 = smov 40  }
 0x21f   : > { %781 = vrot.lane.b32.xlu1 %v1873_v25, %s1706_s22  ;;  %s1714_s22 = smov 8  }
 0x223   : > { %779 = vrot.lane.b32.xlu1 %v537_v27, %s1707_s23 }
 0x227   : > { %900 = vrot.lane.b32.xlu1 %v1873_v25, %s1708_s24 }
 0x22b   : > { %898 = vrot.lane.b32.xlu1 %v537_v27, %s1709_s30  ;;  %s429_s30 = sand.u32 1, %s1691_s26  }
 0x289   : > { %v547_v29 = vpop.permute.xlu1 %546 }
 0x28a   : > { %v553_v30 = vsel %vm548_vm2, %v547_v29, 0 }
 0x28b   : > { %1465 = vmatpush3.bf16.xpose.msra.mxu0 %v553_v30  ;;  %v661_v34 = vpop.permute.xlu0 %660 }
 0x28c   : > { %1470 = vmatprep.subr.bf16.mxu0 %v1701_v8 }
 0x28d   : > { %v663_v31 = vpop.permute.xlu1 %662 }
 0x28e   : > { %v668_v32 = vsel %vm548_vm2, %v663_v31, 0 }
 0x28f   : > { %1477 = vmatpush3.bf16.xpose.msra.mxu1 %v668_v32 }
 0x290   : > { %1488 = vmatprep.subr.bf16.mxu1 %v1701_v8 }
 0x291   : > { %v782_v33 = vpop.permute.xlu1 %781 }
 0x292   : > { %1467 = vmatmul.mubr.msk.bf16.vlgmr.msra.gmra.mxu0 %vm548_vm2, %v537_v27  ;;  %v787_v36 = vsel %vm548_vm2, %v782_v33, 0 }
 0x293   : > { %1472 = vmatprep.mubr.msk.bf16.mxu0 %vm1702_vm1, %v1701_v8 }
 0x295   : > { %v780_v35 = vpop.permute.xlu1 %779 }
 0x296   : > { %1479 = vmatmul.mubr.msk.bf16.vlgmr.msra.gmra.mxu1 %vm548_vm2, %v661_v34 }
 0x297   : > { %1489 = vmatpush3.bf16.xpose.msra.mxu1 %v787_v36  ;;  %1490 = vmatprep.mubr.msk.bf16.mxu1 %vm1702_vm1, %v1701_v8 }
 0x298   : > { %1500 = vmatprep.subr.bf16.mxu1 %v1701_v8 }
 0x299   : > { %v901_v37 = vpop.permute.xlu1 %900 }
 0x29a   : > { %v906_v38 = vsel %vm548_vm2, %v901_v37, 0 }
 0x29d   : > { %v899_v39 = vpop.permute.xlu1 %898 }
 0x29e   : > { %1491 = vmatmul.mubr.msk.bf16.vlgmr.msra.gmra.mxu1 %vm548_vm2, %v780_v35 }
 0x29f   : > { %1501 = vmatpush3.bf16.xpose.msra.mxu1 %v906_v38  ;;  %1502 = vmatprep.mubr.msk.bf16.mxu1 %vm1702_vm1, %v1701_v8 }
 0x2a0   : > { %1512 = vmatprep.subr.bf16.mxu1 %v1701_v8 }
 0x2a6   : > { %1503 = vmatmul.mubr.msk.bf16.vlgmr.msra.gmra.mxu1 %vm548_vm2, %v899_v39 }
 0x2a7   : > { %1516 = vmatprep.mubr.msk.bf16.mxu1 %vm1702_vm1, %v1701_v8 }
 0x352   : > { %v589_v44 = vpop.f32.mrf.mxu0 }
 0x353   : > { %v590_v45 = vadd.f32 %v589_v44, %v544_v43 }
 0x354   : > { %v1468_v46 = vpop.f32.mrf.mxu0 }
 0x355   : > { %v595_v47 = vsel %vm548_vm2, %v590_v45, -inf }
 0x356   : > { %v704_v48 = vpop.f32.mrf.mxu1  ;;  %596 = vmax.xlane.f32.xlu1 %v595_v47  ;;  %v592_v49 = vpop.f32.mrf.mxu0 }
 0x357   : > { %v705_v50 = vadd.f32 %v704_v48, %v544_v43 }
 0x358   : > { %v1469_v51 = vpop.f32.mrf.mxu0  ;;  %v1480_v52 = vpop.f32.mrf.mxu1 }
 0x359   : > { %v710_v53 = vsel %vm548_vm2, %v705_v50, -inf }
 0x35a   : > { %711 = vmax.xlane.f32.xlu0 %v710_v53  ;;  %v707_v54 = vpop.f32.mrf.mxu1 }
 0x35c   : > { %v1481_v55 = vpop.f32.mrf.mxu1 }
 0x35e   : > { %v823_v56 = vpop.f32.mrf.mxu1 }
 0x35f   : > { %v824_v2 = vadd.f32 %v823_v56, %v544_v43 }
 0x360   : > { %v1492_v57 = vpop.f32.mrf.mxu1 }
 0x361   : > { %v829_v3 = vsel %vm548_vm2, %v824_v2, -inf }
 0x362   : > { %v826_v58 = vpop.f32.mrf.mxu1 }
 0x363   : > { %v1605_v58 = vld [vmem:[%s2057_s5 + $0x8] sm:$0xff]  }
 0x364   : > { %v1493_v59 = vpop.f32.mrf.mxu1  ;;  %1513 = vmatpush3.bf16.msra.mxu1 %v1605_v58 }
 0x365   : > { %1514 = vmatprep.subr.bf16.mxu1 %v1701_v8 }
 0x366   : > { %v942_v60 = vpop.f32.mrf.mxu1 }
 0x367   : > { %v943_v61 = vadd.f32 %v942_v60, %v544_v43  ;;  %605 = vrot.lane.b32.xlu1 %v1873_v25, %s1710_s15  ;;  %s1377_s15 = sshll.u32 %s429_s30, 3 }
 0x368   : > { %v1504_v62 = vpop.f32.mrf.mxu1 }
 0x369   : > { %v948_v63 = vsel %vm548_vm2, %v943_v61, -inf }
 0x36a   : > { %949 = vmax.xlane.f32.xlu0 %v948_v63  ;;  %v945_v0 = vpop.f32.mrf.mxu1 }
 0x36c   : > { %v1505_v1 = vpop.f32.mrf.mxu1 }
 0x380   : > { %720 = vrot.lane.b32.xlu0 %v1873_v25, %s1711_s16  ;;  %s1715_s16 = smov 16  }
 0x38b   : > { %830 = vmax.xlane.f32.xlu1 %v829_v3 }
 0x39c   : > { %839 = vrot.lane.b32.xlu1 %v1873_v25, %s1712_s20  ;;  %s1716_s20 = smov 24  }
 0x3a0   : > { %958 = vrot.lane.b32.xlu1 %v1873_v25, %s1713_s21  ;;  %s1416_s21 = sshll.u32 %s1809_s29, 7  ;;  %s1301_s29 = scalar_lea.sflag [#allocation4], %s429_s30 }
 0x3a1   : > { %s2010_s1 = scalar_lea.hbm %s2065_s13, %s1416_s21 }
 0x3df   : > { %v597_v4 = vpop.xlane.xlu1 %596 }
 0x3e0   : > { %v598_v5 = vsub.f32 %v590_v45, %v597_v4 }
 0x3e2   : > { %v599_v6 = vmul.f32 1.442695, %v598_v5 }
 0x3e3   : > { %v712_v7 = vpop.xlane.xlu0 %711  ;;  %v606_v9 = vpop.permute.xlu1 %605 }
 0x3e4   : > { %1619 = vpow2.f32 %v599_v6  ;;  %v713_v10 = vsub.f32 %v705_v50, %v712_v7  ;;  %v612_v11 = vsel %vm610_vm4, %v606_v9, 0 }
 0x3e5   : > { %1471 = vmatpush3.bf16.msra.mxu0 %v612_v11 }
 0x3e6   : > { %v714_v12 = vmul.f32 1.442695, %v713_v10  ;;  %1482 = vmatprep.subr.bf16.mxu0 %v1701_v8 }
 0x3e8   : > { %1621 = vpow2.f32 %v714_v12 }
 0x3f1   : > { %v1620_v13 = vpop.eup %1619 }
 0x3f2   : > { %v604_v14 = vpack.c.bf16 %v1620_v13, %v1620_v13  ;;  %v601_v26 = vsel %vm548_vm2, %v1620_v13, 0.0  ;;  %v1396_v13 = vld [vmem:[%s2058_s6] ss:$0 sm:$0xff] }
 0x3f3   : > { %v950_v15 = vpop.xlane.xlu0 %949 }
 0x3f4   : > { %v951_v16 = vsub.f32 %v943_v61, %v950_v15  ;;  %1473 = vmatmul.mubr.msk.bf16.vlgmr.msra.gmra.mxu0 %vm548_vm2, %v604_v14  ;;  %v1606_v61 = vld [vmem:[%s2057_s5] sm:$0xff]  }
 0x3f5   : > { %v1622_v17 = vpop.eup %1621  ;;  %1484 = vmatprep.mubr.msk.bf16.mxu0 %vm1702_vm1, %v1701_v8  ;;  %1515 = vmatpush3.bf16.msra.mxu1 %v1606_v61 }
 0x3f6   : > { %v952_v19 = vmul.f32 1.442695, %v951_v16  ;;  %v716_v20 = vsel %vm548_vm2, %v1622_v17, 0.0  ;;  %v719_v23 = vpack.c.bf16 %v1622_v17, %v1622_v17  ;;  %1528 = vmatprep.subr.bf16.mxu1 %v1701_v8 }
 0x3f7   : > { %717 = vadd.xlane.f32.xlu0 %v716_v20  ;;  %v721_v21 = vpop.permute.xlu0 %720 }
 0x3f8   : > { %1623 = vpow2.f32 %v952_v19  ;;  %v726_v22 = vsel %vm610_vm4, %v721_v21, 0 }
 0x3f9   : > { %1483 = vmatpush3.bf16.msra.mxu0 %v726_v22 }
 0x3fa   : > { %1494 = vmatprep.subr.bf16.mxu0 %v1701_v8 }
 0x3fc   : > { %1485 = vmatmul.mubr.msk.bf16.vlgmr.msra.gmra.mxu0 %vm548_vm2, %v719_v23 }
 0x3fd   : > { %1496 = vmatprep.mubr.msk.bf16.mxu0 %vm1702_vm1, %v1701_v8 }
 0x405   : > { %v1624_v24 = vpop.eup %1623 }
 0x406   : > { %v954_v25 = vsel %vm548_vm2, %v1624_v24, 0.0  ;;  %v957_v37 = vpack.c.bf16 %v1624_v24, %v1624_v24 }
 0x407   : > { %955 = vadd.xlane.f32.xlu0 %v954_v25 }
 0x40b   : > { %602 = vadd.xlane.f32.xlu0 %v601_v26 }
 0x414   : > { %v831_v27 = vpop.xlane.xlu1 %830 }
 0x415   : > { %v832_v28 = vsub.f32 %v824_v2, %v831_v27  ;;  %v1607_v27 = vld [vmem:[%s2061_s9 + $0x8] sm:$0xff]  }
 0x417   : > { %v833_v29 = vmul.f32 1.442695, %v832_v28  ;;  %v1609_v28 = vld [vmem:[%s2063_s11 + $0x38] sm:$0xff]  }
 0x418   : > { %v840_v30 = vpop.permute.xlu1 %839 }
 0x419   : > { %1625 = vpow2.f32 %v833_v29  ;;  %v845_v31 = vsel %vm610_vm4, %v840_v30, 0  ;;  %v1610_v29 = vld [vmem:[%s2063_s11 + $0x30] sm:$0xff]  }
 0x41a   : > { %1495 = vmatpush3.bf16.msra.mxu0 %v845_v31 }
 0x41b   : > { %1506 = vmatprep.subr.bf16.mxu0 %v1701_v8 }
 0x41c   : > { %v959_v33 = vpop.permute.xlu1 %958 }
 0x41d   : > { %v964_v36 = vsel %vm610_vm4, %v959_v33, 0 }
 0x426   : > { %v1626_v32 = vpop.eup %1625 }
 0x427   : > { %v835_v34 = vsel %vm548_vm2, %v1626_v32, 0.0  ;;  %v838_v35 = vpack.c.bf16 %v1626_v32, %v1626_v32 }
 0x428   : > { %836 = vadd.xlane.f32.xlu1 %v835_v34  ;;  %v1400_v34 = vld [vmem:[%s2059_s7] ss:$0 sm:$0xff] }
 0x429   : > { %1497 = vmatmul.mubr.msk.bf16.vlgmr.msra.gmra.mxu0 %vm548_vm2, %v838_v35 }
 0x42a   : > { %1507 = vmatpush3.bf16.msra.mxu0 %v964_v36  ;;  %1508 = vmatprep.mubr.msk.bf16.mxu0 %vm1702_vm1, %v1701_v8  ;;  %v1401_v36 = vld [vmem:[%s2060_s8] ss:$0 sm:$0xff] }
 0x42b   : > { %1520 = vmatprep.subr.bf16.mxu0 %v1701_v8 }
 0x431   : > { %1509 = vmatmul.mubr.msk.bf16.vlgmr.msra.gmra.mxu0 %vm548_vm2, %v957_v37 }
 0x432   : > { %1524 = vmatprep.mubr.msk.bf16.mxu0 %vm1702_vm1, %v1701_v8  ;;  %1521 = vmatpush3.bf16.msra.mxu0 %v1607_v27 }
 0x433   : > { %1522 = vmatprep.subr.bf16.mxu0 %v1701_v8 }
 0x480   : > { %v718_v38 = vpop.xlane.xlu0 %717 }
 0x490   : > { %v956_v39 = vpop.xlane.xlu0 %955 }
 0x494   : > { %v603_v40 = vpop.xlane.xlu0 %602 }
 0x495   : > { %1627 = vrcp.f32 %v603_v40  ;;  %v1611_v40 = vld [vmem:[%s2063_s11 + $0x28] sm:$0xff]  }
 0x496   : > { %1629 = vrcp.f32 %v718_v38 }
 0x4a2   : > { %v1628_v41 = vpop.eup %1627 }
 0x4a3   : > { %v1630_v48 = vpop.eup %1629 }
 0x4b1   : > { %v837_v55 = vpop.xlane.xlu1 %836 }
 0x4b2   : > { %1631 = vrcp.f32 %v837_v55 }
 0x4b3   : > { %1633 = vrcp.f32 %v956_v39 }
 0x4b4   : > { %v648_v42 = vpop.f32.mrf.mxu0 }
 0x4b5   : > { %v655_v43 = vmul.f32 %v1628_v41, %v648_v42  ;;  %v1612_v41 = vld [vmem:[%s2063_s11 + $0x20] sm:$0xff]   ;;  %v1613_v42 = vld [vmem:[%s2063_s11 + $0x18] sm:$0xff]  }
 0x4b6   : > { %v1474_v44 = vpop.f32.mrf.mxu0 }
 0x4b7   : > { %v656_v45 = vpack.c.bf16 %v655_v43, %v655_v43  ;;  %v1614_v43 = vld [vmem:[%s2063_s11 + $0x10] sm:$0xff]   ;;  %v1615_v44 = vld [vmem:[%s2063_s11 + $0x8] sm:$0xff]  }
 0x4b8   : > { %v651_v46 = vpop.f32.mrf.mxu0 }
 0x4b9   : > { %658 = vst.msk [vmem:[#allocation2] sm:$0xf] %vm657_vm5, %v656_v45  ;;  %v1616_v45 = vld [vmem:[%s2063_s11] sm:$0xff]  }
 0x4ba   : > { %v1475_v47 = vpop.f32.mrf.mxu0  ;;  %v1402_v46 = vld [vmem:[%s2062_s10] ss:$0 sm:$0xff] }
 0x4bc   : > { %v762_v49 = vpop.f32.mrf.mxu0 }
 0x4bd   : > { %v769_v50 = vmul.f32 %v1630_v48, %v762_v49 }
 0x4be   : > { %v1486_v51 = vpop.f32.mrf.mxu0 }
 0x4bf   : > { %v1419_v52 = vpack.c.bf16 %v769_v50, %v769_v50  ;;  %v1632_v56 = vpop.eup %1631 }
 0x4c0   : > { %v765_v53 = vpop.f32.mrf.mxu0  ;;  %v1634_v1 = vpop.eup %1633 }
 0x4c1   : > { %774 = vrot.lane.b32.xlu1 %v1419_v52, %s1714_s22  ;;  %s431_s22 = scalar_lea.vmem [#allocation3], %s1377_s15 }
 0x4c2   : > { %v1487_v54 = vpop.f32.mrf.mxu0  ;;  %s1314_s23 = sshll.u32 %s431_s22, 4  ;;  %s2012_s23 = int_to_ptr.vmem [resolvable:$true] %s1314_s23 }
 0x4c3   : > { %s1639_s15 = scalar_lea.vmem %s2012_s23, 128 }
 0x4c4   : > { %p1640_p11 = scmp.ne.s32.totalorder %s2012_s23, %s1639_s15 }
 0x4c6   : > { %p1641_p12 = pnand %p1640_p11, %p1826_p5 }
 0x4c8   : > { %p1642_p13 = pneg %p1641_p12 }
 0x4e9   : > { %v881_v57 = vpop.f32.mrf.mxu0 }
 0x4ea   : > { %v888_v59 = vmul.f32 %v1632_v56, %v881_v57  ;;  %v1406_v57 = vld [vmem:[%s2064_s12] ss:$0 sm:$0xff] }
 0x4eb   : > { %v1498_v60 = vpop.f32.mrf.mxu0 }
 0x4ec   : > { %v1420_v62 = vpack.c.bf16 %v888_v59, %v888_v59 }
 0x4ed   : > { %v884_v63 = vpop.f32.mrf.mxu0 }
 0x4ee   : > { %893 = vrot.lane.b32.xlu0 %v1420_v62, %s1715_s16  ;;  %s1717_s16 = smov [#allocation3]  }
 0x4ef   : > { %v1499_v0 = vpop.f32.mrf.mxu0 }
 0x4f1   : > { %v1000_v2 = vpop.f32.mrf.mxu0 }
 0x4f2   : > { %v1007_v3 = vmul.f32 %v1634_v1, %v1000_v2 }
 0x4f3   : > { %v1510_v4 = vpop.f32.mrf.mxu0 }
 0x4f4   : > { %v1421_v5 = vpack.c.bf16 %v1007_v3, %v1007_v3 }
 0x4f5   : > { %v1003_v6 = vpop.f32.mrf.mxu0 }
 0x4f6   : > { %1012 = vrot.lane.b32.xlu1 %v1421_v5, %s1716_s20  ;;  %s1643_s20 = sshll.u32 %s1717_s16, 4  ;;  %s1644_s20 = int_to_ptr.vmem [resolvable:$false] %s1643_s20 }
 0x4f7   : > { %v1511_v7 = vpop.f32.mrf.mxu0  ;;  %s1645_s0 = scalar_lea.vmem %s1644_s20, 256  ;;  %p1646_p0 = scmp.lt.s32.totalorder %s2012_s23, %s1644_s20 }
 0x4f8   : > { %p1647_p1 = scmp.lt.s32.totalorder %s1645_s0, %s1639_s15 }
 0x4fa   : > { %p1648_p2 = por %p1647_p1, %p1646_p0 }
 0x4fc   : > { %p1649_p3 = pnand %p1648_p2, %p1642_p13 }
 0x533   : > { %v775_v9 = vpop.permute.xlu1 %774 }
 0x534   : > { %778 = vst.msk [vmem:[#allocation2] sm:$0xf] %vm777_vm6, %v775_v9 }
 0x560   : > { %v894_v10 = vpop.permute.xlu0 %893 }
 0x561   : > { %897 = vst.msk [vmem:[#allocation2] sm:$0xf] %vm896_vm7, %v894_v10 }
 0x568   : > { %v1013_v11 = vpop.permute.xlu1 %1012 }
 0x569   : > { %1016 = vst.msk [vmem:[#allocation2] sm:$0xf] %vm1015_vm8, %v1013_v11 }
 0x570   : > { %v1017_v12 = vld [vmem:[#allocation2] sm:$0xf] }
 0x571   : > { %1517 = vmatmul.mubr.msk.bf16.vlgmr.msra.gmra.mxu1 %vm440_vm0, %v1017_v12 }
 0x572   : > { %1544 = vmatprep.mubr.msk.bf16.mxu1 %vm1702_vm1, %v1701_v8  ;;  %1529 = vmatpush3.bf16.msra.mxu1 %v1609_v28 }
 0x573   : > { %1530 = vmatprep.subr.bf16.mxu1 %v1701_v8 }
 0x576   : > { %1531 = vmatpush3.bf16.msra.mxu1 %v1610_v29 }
 0x577   : > { %1532 = vmatprep.subr.bf16.mxu1 %v1701_v8 }
 0x57a   : > { %1533 = vmatpush3.bf16.msra.mxu1 %v1611_v40 }
 0x57b   : > { %1534 = vmatprep.subr.bf16.mxu1 %v1701_v8 }
 0x57e   : > { %1535 = vmatpush3.bf16.msra.mxu1 %v1612_v41 }
 0x57f   : > { %1536 = vmatprep.subr.bf16.mxu1 %v1701_v8 }
 0x582   : > { %1537 = vmatpush3.bf16.msra.mxu1 %v1613_v42 }
 0x583   : > { %1538 = vmatprep.subr.bf16.mxu1 %v1701_v8 }
 0x586   : > { %1539 = vmatpush3.bf16.msra.mxu1 %v1614_v43 }
 0x587   : > { %1540 = vmatprep.subr.bf16.mxu1 %v1701_v8 }
 0x58a   : > { %1541 = vmatpush3.bf16.msra.mxu1 %v1615_v44 }
 0x58b   : > { %1542 = vmatprep.subr.bf16.mxu1 %v1701_v8 }
 0x58e   : > { %1543 = vmatpush3.bf16.msra.mxu1 %v1616_v45 }
 0x631   : > { %v1078_v14 = vpop.f32.mrf.mxu1 }
 0x632   : > { %v1079_v15 = vadd.f32 %v1396_v13, %v1078_v14 }
 0x633   : > { %v1518_v16 = vpop.f32.mrf.mxu1 }
 0x634   : > { %v1947_v17 = vadd.f32 %v1079_v15, %v1863_v18  ;;  %v1608_v18 = vld [vmem:[%s2061_s9] sm:$0xff]  }
 0x635   : > { %v1081_v19 = vpop.f32.mrf.mxu1  ;;  %1523 = vmatpush3.bf16.msra.mxu0 %v1608_v18 }
 0x636   : > { %v1087_v20 = vsel %vm440_vm0, %v1947_v17, 0.0 }
 0x637   : > { %1088 = vadd.xlane.f32.xlu1 %v1087_v20  ;;  %v1519_v21 = vpop.f32.mrf.mxu1 }
 0x6c0   : > { %v1089_v22 = vpop.xlane.xlu1 %1088 }
 0x6c1   : > { %v1090_v23 = vmul.f32 0.03125, %v1089_v22 }
 0x6c3   : > { %v1091_v24 = vsub.f32 %v1947_v17, %v1090_v23 }
 0x6c5   : > { %v1092_v25 = vmul.f32 %v1091_v24, %v1091_v24 }
 0x6c7   : > { %v1093_v26 = vsel %vm440_vm0, %v1092_v25, 0.0 }
 0x6c8   : > { %1094 = vadd.xlane.f32.xlu0 %v1093_v26 }
 0x751   : > { %v1095_v30 = vpop.xlane.xlu0 %1094 }
 0x752   : > { %v1096_v31 = vmul.f32 0.03125, %v1095_v30 }
 0x754   : > { %v1097_v32 = vadd.f32 1e-05, %v1096_v31 }
 0x756   : > { %1635 = vrsqrt.f32 %v1097_v32 }
 0x763   : > { %v1636_v33 = vpop.eup %1635 }
 0x764   : > { %v1099_v35 = vmul.f32 %v1636_v33, %v1091_v24 }
 0x766   : > { %v1106_v37 = vmul.f32 %v1400_v34, %v1099_v35 }
 0x768   : > { %v1113_v38 = vadd.f32 %v1401_v36, %v1106_v37 }
 0x76a   : > { %v1114_v39 = vpack.c.bf16 %v1113_v38, %v1113_v38 }
 0x76c   : > { %1525 = vmatmul.mubr.msk.bf16.vlgmr.msra.gmra.mxu0 %vm440_vm0, %v1114_v39 }
 0x82c   : > { %v1175_v47 = vpop.f32.mrf.mxu0 }
 0x82d   : > { %v1176_v48 = vadd.f32 %v1402_v46, %v1175_v47 }
 0x82e   : > { %v1526_v49 = vpop.f32.mrf.mxu0 }
 0x82f   : > { %v1182_v50 = vmul.f32 0.70710677, %v1176_v48  ;;  %v1181_v8 = vmul.f32 0.5, %v1176_v48 }
 0x830   : > { %v1178_v51 = vpop.f32.mrf.mxu0 }
 0x831   : > { %1637 = verf.f32 %v1182_v50 }
 0x832   : > { %v1527_v52 = vpop.f32.mrf.mxu0 }
 0x83e   : > { %v1638_v53 = vpop.eup %1637 }
 0x83f   : > { %v1184_v54 = vadd.f32 1.0, %v1638_v53 }
 0x841   : > { %v1185_v55 = vmul.f32 %v1184_v54, %v1181_v8 }
 0x843   : > { %v1186_v56 = vpack.c.bf16 %v1185_v55, %v1185_v55 }
 0x845   : > { %1545 = vmatmul.mubr.bf16.vlgmr.msra.gmra.mxu1 %v1186_v56 }
 0x905   : > { %v1292_v58 = vpop.f32.mrf.mxu1 }
 0x906   : > { %v1293_v59 = vadd.f32 %v1406_v57, %v1292_v58 }
 0x907   : > { %v1546_v60 = vpop.f32.mrf.mxu1 }
 0x908   : > { %v1298_v61 = vadd.f32 %v1293_v59, %v1947_v17 }
 0x909   : > { %v1295_v62 = vpop.f32.mrf.mxu1 }
 0x90a   : > { %1299 = vst.msk [vmem:[%s431_s22] sm:$0xff] %vm440_vm0, %v1298_v61 }
 0x90b   : > { %v1547_v63 = vpop.f32.mrf.mxu1 }
 0x90c   : > { %1652 = shalt.err (!%p1649_p3)
}
 0x90d   : > { %s1653_s21 = scalar_lea.hbm %s2010_s1, 128  ;;  %s1657_s24 = scalar_lea.hbm %s2065_s13, 256 }
 0x90e   : > { %p1654_p4 = scmp.ne.s32.totalorder %s2010_s1, %s1653_s21  ;;  %p1658_p9 = scmp.lt.s32.totalorder %s2010_s1, %s2065_s13 }
 0x90f   : > { %p1659_p10 = scmp.lt.s32.totalorder %s1657_s24, %s1653_s21 }
 0x910   : > { %p1655_p7 = pnand %p1654_p4, %p1826_p5 }
 0x911   : > { %p1660_p11 = por %p1659_p10, %p1658_p9 }
 0x912   : > { %p1656_p8 = pneg %p1655_p7 }
 0x914   : > { %p1661_p12 = pnand %p1660_p11, %p1656_p8 }
 0x916   : > { %1664 = shalt.err (!%p1661_p12)
}
 0x917   : > { %1548 = dma.vmem_to_hbm [thread:$0]  (%p1826_p5), %s2012_s23, 128, %s2010_s1, %s1301_s29  }
 0x918 PF: > { %p1554_p13 = scmp.ge.s32.totalorder %s1699_s28, 2  ;;  %s1326_s15 = sand.u32 1, %s1687_s25  }
 0x919   : > { %s1327_s2 = scalar_lea.sflag [#allocation4], %s1326_s15 }
 0x91a   : > { %p1551_p0 = pnand %p1554_p13, %p1830_p6 }
 0x91c   : > { %p1552_p1 = pneg %p1551_p0 }
 0x91e   : > { %1682 = dma.done.wait (%p1552_p1), %s1327_s2, 128  }
 0x91f   : > { %1684 = vsyncadd (%p1552_p1), %s1327_s2, 4294967168  ;;  %p23_p2 = scmp.ge.s32.totalorder %s1813_s14, 4   ;;  %s2074_s25 = smov %s1691_s26 }
 0x920   : > { %s2075_s26 = smov %s1695_s27  ;;  %s2076_s27 = smov %s1824_s17 }
 0x921   : > { %s2077_s28 = smov %s1813_s14  ;;  %25 = sbr.rel (!%p23_p2) target bundleno = 7 (0x7), region = 107 }
 0x926   :  { %1332 = vsyncpa [#allocation4], 1 }
 0x927   :  { %1334 = vsyncpa [#allocation4 + $0x1], 1 }

</bundles_post_ra>
